<compile_context>
chip_gen: v5e
topology: v5e:2x2
jax: 0.10.0
libtpu: 0.0.40
codegen_flags: <defaults>
</compile_context>

<pallas_src>
import functools

import jax
import jax.numpy as jnp
from jax.experimental import pallas as pl
from jax.experimental.pallas import tpu as pltpu

K_IN = 784      # 28*28*1 — kept un-padded; x streams as f32 full-row blocks
H1_PAD = 128    # 64  -> 128 (lane-dense VMEM layout)
H2_PAD = 128    # 32  -> 128
OUT_PAD = 16    # 10  -> 16 (small contiguous f32 writeback; sliced to 10 outside)
N_OUT = 10


def mlp_kernel(x_ref, w1_ref, b1_ref, w2_ref, b2_ref, w3_ref, b3_ref, o_ref):
    # Layer 1: cast the f32 x tile to bf16 *inside* the kernel (no extra HBM pass);
    # bf16 x bf16 MXU matmul with f32 accumulation.
    x = x_ref[...].astype(jnp.bfloat16)
    h1 = jnp.dot(x, w1_ref[...], preferred_element_type=jnp.float32)
    h1 = jnp.maximum(h1 + b1_ref[...], 0.0)
    # Layers 2-3: f32 activations x f32 weights — MXU is heavily underutilized here,
    # so keeping full precision costs no wall time.
    h2 = jnp.dot(h1, w2_ref[...], preferred_element_type=jnp.float32)
    h2 = jnp.maximum(h2 + b2_ref[...], 0.0)
    out = jnp.dot(h2, w3_ref[...], preferred_element_type=jnp.float32) + b3_ref[...]
    o_ref[...] = out.astype(o_ref.dtype)


def _round_up(x, m):
    return ((x + m - 1) // m) * m


def prepare_params(params):
    """Pad / cast the weights ONCE (hoisted out of the per-call forward)."""
    w1, b1, w2, b2, w3, b3 = params
    w1_p = jnp.pad(w1, ((0, 0), (0, H1_PAD - w1.shape[1]))).astype(jnp.bfloat16)
    b1_p = jnp.pad(b1, ((0, 0), (0, H1_PAD - b1.shape[1]))).astype(jnp.float32)
    w2_p = jnp.pad(w2, ((0, H1_PAD - w2.shape[0]),
                        (0, H2_PAD - w2.shape[1]))).astype(jnp.float32)
    b2_p = jnp.pad(b2, ((0, 0), (0, H2_PAD - b2.shape[1]))).astype(jnp.float32)
    w3_p = jnp.pad(w3, ((0, H2_PAD - w3.shape[0]),
                        (0, OUT_PAD - w3.shape[1]))).astype(jnp.float32)
    b3_p = jnp.pad(b3, ((0, 0), (0, OUT_PAD - b3.shape[1]))).astype(jnp.float32)
    return (w1_p, b1_p, w2_p, b2_p, w3_p, b3_p)


def mlp_forward(x_nchw, padded_params, *, max_tb=512):
    """x_nchw: (B, 1, 28, 28) float32. Returns logits (B, 10) float32."""
    w1_p, b1_p, w2_p, b2_p, w3_p, b3_p = padded_params
    B = x_nchw.shape[0]
    # Flatten exactly like torch.nn.Flatten (row-major over C,H,W).
    x = x_nchw.reshape(B, -1).astype(jnp.float32)          # (B, 784), no K pad

    # Batch tiling: always >= 2 grid steps (v7x megacore can split the batch across
    # both TensorCores); TB derived from B to minimize tail padding; max_tb=512
    # keeps per-step x DMA >= 1 MiB while staying well inside the v5e 16 MiB
    # scoped-VMEM default.
    n_steps = max(2, pl.cdiv(B, max_tb))
    TB = _round_up(pl.cdiv(B, n_steps), 8)
    B_pad = TB * n_steps
    if B_pad != B:                                          # only copy when needed
        x = jnp.pad(x, ((0, B_pad - B), (0, 0)))            # rows only, stays f32

    grid = (n_steps,)

    # x streams with the grid; weights/biases have constant index_maps so Pallas
    # keeps them VMEM-resident (no re-DMA across iterations).
    in_specs = [
        pl.BlockSpec((TB, K_IN), lambda i: (i, 0)),
        pl.BlockSpec((K_IN, H1_PAD), lambda i: (0, 0)),
        pl.BlockSpec((1, H1_PAD), lambda i: (0, 0)),
        pl.BlockSpec((H1_PAD, H2_PAD), lambda i: (0, 0)),
        pl.BlockSpec((1, H2_PAD), lambda i: (0, 0)),
        pl.BlockSpec((H2_PAD, OUT_PAD), lambda i: (0, 0)),
        pl.BlockSpec((1, OUT_PAD), lambda i: (0, 0)),
    ]
    out_specs = pl.BlockSpec((TB, OUT_PAD), lambda i: (i, 0))

    flops = 2 * B_pad * (K_IN * H1_PAD + H1_PAD * H2_PAD + H2_PAD * OUT_PAD)
    bytes_accessed = (
        x.size * 4                                           # f32 input stream
        + w1_p.size * 2                                      # bf16 layer-1 weights
        + (w2_p.size + w3_p.size
           + b1_p.size + b2_p.size + b3_p.size) * 4          # f32 resident params
        + B_pad * OUT_PAD * 4                                # f32 output
    )

    out_padded = pl.pallas_call(
        mlp_kernel,
        out_shape=jax.ShapeDtypeStruct((B_pad, OUT_PAD), jnp.float32),
        grid_spec=pltpu.PrefetchScalarGridSpec(
            num_scalar_prefetch=0,
            grid=grid,
            in_specs=in_specs,
            out_specs=out_specs,
        ),
        compiler_params=pltpu.CompilerParams(
            dimension_semantics=("parallel",),
        ),
        cost_estimate=pl.CostEstimate(
            flops=flops, transcendentals=0, bytes_accessed=bytes_accessed),
    )(x, w1_p, b1_p, w2_p, b2_p, w3_p, b3_p)

    return out_padded[:B, :N_OUT]


def init_params(key):
    """Deterministic synthetic parameter init (shapes from the nn.Module)."""
    k1, k2, k3 = jax.random.split(key, 3)

    def linear(k, fan_in, fan_out):
        # uniform(-1/sqrt(fan_in), 1/sqrt(fan_in)) like torch.nn.Linear default
        bound = 1.0 / jnp.sqrt(fan_in)
        kw, kb = jax.random.split(k)
        w = jax.random.uniform(kw, (fan_in, fan_out), jnp.float32, -bound, bound)
        b = jax.random.uniform(kb, (1, fan_out), jnp.float32, -bound, bound)
        return w, b

    w1, b1 = linear(k1, 28 * 28 * 1, 64)
    w2, b2 = linear(k2, 64, 32)
    w3, b3 = linear(k3, 32, 10)
    return (w1, b1, w2, b2, w3, b3)


def mlp_reference(x_nchw, params):
    """Pure-f32 JAX reference matching the PyTorch module."""
    w1, b1, w2, b2, w3, b3 = params
    x = x_nchw.reshape(x_nchw.shape[0], -1)
    h1 = jnp.maximum(x @ w1 + b1, 0.0)
    h2 = jnp.maximum(h1 @ w2 + b2, 0.0)
    return h2 @ w3 + b3


if __name__ == "__main__":
    key = jax.random.PRNGKey(0)
    kx, kp = jax.random.split(key)
    # MNIST-style input implied by the 28*28*1 flatten: (batch=2, C=1, H=28, W=28)
    x = jax.random.normal(kx, (2, 1, 28, 28), jnp.float32)
    params = init_params(kp)
    padded_params = prepare_params(params)   # pad/cast once, outside the forward

    fwd = jax.jit(functools.partial(mlp_forward, max_tb=512))
    y = jax.block_until_ready(fwd(x, padded_params))

    y_ref = mlp_reference(x, params)
    assert y.shape == (2, 10), y.shape
    # Only x and w1 see bf16 (f32 MXU accumulation); layers 2-3 are full f32.
    assert jnp.allclose(y, y_ref, atol=2e-2, rtol=2e-2), (y, y_ref)

    print("KERNEL_OK")
</pallas_src>

<mosaic_0001>
module attributes {stable_mosaic.version = 11 : i64} {
  func.func @mlp_kernel(%arg0: i32, %arg1: memref<8x784xf32, #tpu.memory_space<vmem>>, %arg2: memref<784x128xbf16, #tpu.memory_space<vmem>>, %arg3: memref<1x128xf32, #tpu.memory_space<vmem>>, %arg4: memref<128x128xf32, #tpu.memory_space<vmem>>, %arg5: memref<1x128xf32, #tpu.memory_space<vmem>>, %arg6: memref<128x16xf32, #tpu.memory_space<vmem>>, %arg7: memref<1x16xf32, #tpu.memory_space<vmem>>, %arg8: memref<8x16xf32, #tpu.memory_space<vmem>>) attributes {dimension_semantics = [#tpu.dimension_semantics<parallel>], iteration_bounds = array<i64: 2>, scalar_prefetch = 0 : i64, scratch_operands = 0 : i64, tpu.core_type = #tpu.core_type<tc>, window_params = [{transform_indices = @transform_0, window_bounds = array<i64: 8, 784>}, {pipeline_mode = #tpu.pipeline_mode<synchronous>, transform_indices = @transform_1, window_bounds = array<i64: 784, 128>}, {pipeline_mode = #tpu.pipeline_mode<synchronous>, transform_indices = @transform_2, window_bounds = array<i64: 1, 128>}, {pipeline_mode = #tpu.pipeline_mode<synchronous>, transform_indices = @transform_3, window_bounds = array<i64: 128, 128>}, {pipeline_mode = #tpu.pipeline_mode<synchronous>, transform_indices = @transform_4, window_bounds = array<i64: 1, 128>}, {pipeline_mode = #tpu.pipeline_mode<synchronous>, transform_indices = @transform_5, window_bounds = array<i64: 128, 16>}, {pipeline_mode = #tpu.pipeline_mode<synchronous>, transform_indices = @transform_6, window_bounds = array<i64: 1, 16>}, {transform_indices = @transform_7, window_bounds = array<i64: 8, 16>}]} {
    %c0 = arith.constant 0 : index
    %c0_0 = arith.constant 0 : index
    %0 = vector.load %arg1[%c0, %c0_0] : memref<8x784xf32, #tpu.memory_space<vmem>>, vector<8x784xf32>
    %1 = arith.truncf %0 : vector<8x784xf32> to vector<8x784xbf16>
    %c0_1 = arith.constant 0 : index
    %c0_2 = arith.constant 0 : index
    %2 = vector.load %arg2[%c0_1, %c0_2] : memref<784x128xbf16, #tpu.memory_space<vmem>>, vector<784x128xbf16>
    %cst = arith.constant dense<0.000000e+00> : vector<8x128xf32>
    %3 = tpu.matmul %1, %2, %cst {dimension_numbers = #tpu.dot_dimension_numbers<[1], [0], [0], [1], [0, 0, 1, 1], [], []>} : vector<8x784xbf16>, vector<784x128xbf16>, vector<8x128xf32> -> vector<8x128xf32>
    %c0_3 = arith.constant 0 : index
    %c0_4 = arith.constant 0 : index
    %4 = vector.load %arg3[%c0_3, %c0_4] : memref<1x128xf32, #tpu.memory_space<vmem>>, vector<1x128xf32>
    %5 = vector.broadcast %4 : vector<1x128xf32> to vector<8x128xf32>
    %6 = arith.addf %3, %5 : vector<8x128xf32>
    %cst_5 = arith.constant 0.000000e+00 : f32
    %7 = vector.broadcast %cst_5 : f32 to vector<8x128xf32>
    %8 = arith.maximumf %6, %7 : vector<8x128xf32>
    %c0_6 = arith.constant 0 : index
    %c0_7 = arith.constant 0 : index
    %9 = vector.load %arg4[%c0_6, %c0_7] : memref<128x128xf32, #tpu.memory_space<vmem>>, vector<128x128xf32>
    %cst_8 = arith.constant dense<0.000000e+00> : vector<8x128xf32>
    %10 = tpu.matmul %8, %9, %cst_8 {dimension_numbers = #tpu.dot_dimension_numbers<[1], [0], [0], [1], [0, 0, 1, 1], [], []>} : vector<8x128xf32>, vector<128x128xf32>, vector<8x128xf32> -> vector<8x128xf32>
    %c0_9 = arith.constant 0 : index
    %c0_10 = arith.constant 0 : index
    %11 = vector.load %arg5[%c0_9, %c0_10] : memref<1x128xf32, #tpu.memory_space<vmem>>, vector<1x128xf32>
    %12 = vector.broadcast %11 : vector<1x128xf32> to vector<8x128xf32>
    %13 = arith.addf %10, %12 : vector<8x128xf32>
    %cst_11 = arith.constant 0.000000e+00 : f32
    %14 = vector.broadcast %cst_11 : f32 to vector<8x128xf32>
    %15 = arith.maximumf %13, %14 : vector<8x128xf32>
    %c0_12 = arith.constant 0 : index
    %c0_13 = arith.constant 0 : index
    %16 = vector.load %arg6[%c0_12, %c0_13] : memref<128x16xf32, #tpu.memory_space<vmem>>, vector<128x16xf32>
    %cst_14 = arith.constant dense<0.000000e+00> : vector<8x16xf32>
    %17 = tpu.matmul %15, %16, %cst_14 {dimension_numbers = #tpu.dot_dimension_numbers<[1], [0], [0], [1], [0, 0, 1, 1], [], []>} : vector<8x128xf32>, vector<128x16xf32>, vector<8x16xf32> -> vector<8x16xf32>
    %c0_15 = arith.constant 0 : index
    %c0_16 = arith.constant 0 : index
    %18 = vector.load %arg7[%c0_15, %c0_16] : memref<1x16xf32, #tpu.memory_space<vmem>>, vector<1x16xf32>
    %19 = vector.broadcast %18 : vector<1x16xf32> to vector<8x16xf32>
    %20 = arith.addf %17, %19 : vector<8x16xf32>
    %c0_17 = arith.constant 0 : index
    %c0_18 = arith.constant 0 : index
    %21 = vector.load %arg8[%c0_17, %c0_18] : memref<8x16xf32, #tpu.memory_space<vmem>>, vector<8x16xf32>
    tpu.vector_store %arg8[%c0_17, %c0_18], %20 {strides = array<i32>} : memref<8x16xf32, #tpu.memory_space<vmem>>, vector<8x16xf32>,
    return
  }
  func.func @transform_0(%arg0: i32) -> (i32, i32) {
    %c0_i32 = arith.constant 0 : i32
    %c0_i32_0 = arith.constant 0 : i32
    return %arg0, %c0_i32 : i32, i32
  }
  func.func @transform_1(%arg0: i32) -> (i32, i32) {
    %c0_i32 = arith.constant 0 : i32
    %c0_i32_0 = arith.constant 0 : i32
    %c0_i32_1 = arith.constant 0 : i32
    return %c0_i32, %c0_i32_0 : i32, i32
  }
  func.func @transform_2(%arg0: i32) -> (i32, i32) {
    %c0_i32 = arith.constant 0 : i32
    %c0_i32_0 = arith.constant 0 : i32
    %c0_i32_1 = arith.constant 0 : i32
    return %c0_i32, %c0_i32_0 : i32, i32
  }
  func.func @transform_3(%arg0: i32) -> (i32, i32) {
    %c0_i32 = arith.constant 0 : i32
    %c0_i32_0 = arith.constant 0 : i32
    %c0_i32_1 = arith.constant 0 : i32
    return %c0_i32, %c0_i32_0 : i32, i32
  }
  func.func @transform_4(%arg0: i32) -> (i32, i32) {
    %c0_i32 = arith.constant 0 : i32
    %c0_i32_0 = arith.constant 0 : i32
    %c0_i32_1 = arith.constant 0 : i32
    return %c0_i32, %c0_i32_0 : i32, i32
  }
  func.func @transform_5(%arg0: i32) -> (i32, i32) {
    %c0_i32 = arith.constant 0 : i32
    %c0_i32_0 = arith.constant 0 : i32
    %c0_i32_1 = arith.constant 0 : i32
    return %c0_i32, %c0_i32_0 : i32, i32
  }
  func.func @transform_6(%arg0: i32) -> (i32, i32) {
    %c0_i32 = arith.constant 0 : i32
    %c0_i32_0 = arith.constant 0 : i32
    %c0_i32_1 = arith.constant 0 : i32
    return %c0_i32, %c0_i32_0 : i32, i32
  }
  func.func @transform_7(%arg0: i32) -> (i32, i32) {
    %c0_i32 = arith.constant 0 : i32
    %c0_i32_0 = arith.constant 0 : i32
    return %arg0, %c0_i32 : i32, i32
  }
}

</mosaic_0001>

<bundles_post_ra>
// kernel: mlp_forward.1
= control target key start
LH: loop header
LB: loop body
LE: loop exit
PB: predicated region body
PF: predicated region fallthrough
CT: control target
= control target key end

     0   :  { %12 = vsyncpa [#allocation3], 0  ;;  %s1315_s24 = smov 0   ;;  %s1559_s0 = inlined_call_operand.vmem [shape: f32[16,784], index: 0, kind: input, shape index: {}]   ;;  %s1560_s1 = inlined_call_operand.vmem [shape: bf16[784,128], index: 1, kind: input, shape index: {}]   ;;  %s1561_s2 = inlined_call_operand.vmem [shape: f32[1,128], index: 2, kind: input, shape index: {}]   ;;  %s1562_s3 = inlined_call_operand.hbm [shape: f32[128,128], index: 3, kind: input, shape index: {}]   ;;  %s1563_s4 = inlined_call_operand.vmem [shape: f32[1,128], index: 4, kind: input, shape index: {}]   ;;  %s1564_s5 = inlined_call_operand.vmem [shape: f32[128,16], index: 5, kind: input, shape index: {}]   ;;  %s1565_s6 = inlined_call_operand.vmem [shape: f32[1,16], index: 6, kind: input, shape index: {}]   ;;  %s1566_s7 = inlined_call_operand.vmem [shape: f32[16,16], index: 7, kind: output, shape index: {}]  }
   0x1 LB: > { %s218_s27 = sshll.u32 %s1562_s3, 4  ;;  %s1324_s28 = sadd.s32 4294967295, %s1270_s24   ;;  %s1270_s24 = sphi %s1315_s24, %s18_s24   ;;  %s219_s27 = int_to_ptr.hbm [resolvable:$true] %s218_s27 }
   0x2   : > { %p950_p0 = scmp.ge.s32.totalorder %s1270_s24, 1  ;;  %p201_p1 = scmp.lt.s32.totalorder %s1270_s24, 3 }
   0x3   : > { %p1214_p2 = scmp.eq.s32.totalorder %s1324_s28, 0  ;;  %s1272_s29 = smov [#allocation2]  }
   0x4   : > { %p202_p3 = pnand %p950_p0, %p201_p1  ;;  %s220_s30 = sshll.u32 %s1272_s29, 4  ;;  %s221_s30 = int_to_ptr.vmem [resolvable:$true] %s220_s30 }
   0x5   : > { %s1273_s8 = smov 128   ;;  %s1274_s9 = smov 8  }
   0x6   : > { %p1210_p4 = pneg %p202_p3  ;;  %253 = sbr.rel (%p202_p3) target bundleno = 481 (0x1e1), region = 48 }
   0x8   : > { %p1211_p5 = pnand %p1214_p2, %p1210_p4 }
   0xa   : > { %1213 = dma.hbm_to_vmem [thread:$0]  (!%p1211_p5), %s219_s27, 2048, %s221_s30, [#allocation3], %s1273_s8, %s1273_s8, %s1274_s9  }
   0xb   : > { %1265 = dma.done.wait (%p1214_p2), [#allocation3], 2048  }
   0xc   : > { %1267 = vsyncadd (%p1214_p2), [#allocation3], 4294965248  ;;  %v1163_v0 = vld [vmem:[%s1560_s1 + $0x38] sm:$0xff]  ;;  %v1162_v3 = vld [vmem:[%s1560_s1 + $0x30] sm:$0xff]  ;;  %p285_p6 = scmp.lt.s32.totalorder %s1324_s28, 1  ;;  %vm705_vm0 = vcmask 130048  }
   0xd   : > { %v1171_v1 = vld [vmem:[%s1560_s1 + $0x78] sm:$0xff]  ;;  %709 = vmatpush.bf16.msra.mxu0 %v1163_v0  ;;  %v1170_v4 = vld [vmem:[%s1560_s1 + $0x70] sm:$0xff]  ;;  %v1161_v8 = vld [vmem:[%s1560_s1 + $0x28] sm:$0xff] }
   0xe   : > { %v1179_v2 = vld [vmem:[%s1560_s1 + $0xb8] sm:$0xff]  ;;  %722 = vmatpush.bf16.msra.mxu1 %v1171_v1  ;;  %v1178_v5 = vld [vmem:[%s1560_s1 + $0xb0] sm:$0xff]  ;;  %v1169_v9 = vld [vmem:[%s1560_s1 + $0x68] sm:$0xff]  ;;  %s1568_s28 = smov (!%p285_p6, %s1324_s28), 1 }
   0xf   : > { %735 = vmatpush.bf16.msra.mxu2 %v1179_v2  ;;  %v1187_v6 = vld [vmem:[%s1560_s1 + $0xf8] sm:$0xff]  ;;  %v1186_v7 = vld [vmem:[%s1560_s1 + $0xf0] sm:$0xff]  ;;  %v1177_v10 = vld [vmem:[%s1560_s1 + $0xa8] sm:$0xff]  ;;  %s1205_s16 = smul.u32 56, %s1568_s28  ;;  %s956_s23 = sshll.u32 %s1568_s28, 3 }
  0x10   : > { %748 = vmatpush.bf16.msra.mxu3 %v1187_v6  ;;  %v1185_v11 = vld [vmem:[%s1560_s1 + $0xe8] sm:$0xff]  ;;  %v1160_v12 = vld [vmem:[%s1560_s1 + $0x20] sm:$0xff]  ;;  %v1159_v16 = vld [vmem:[%s1560_s1 + $0x18] sm:$0xff]  ;;  %s293_s8 = scalar_lea.vmem %s1566_s7, %s956_s23 }
  0x11   : > { %710 = vmatpush.bf16.msra.mxu0 %v1162_v3  ;;  %v1168_v13 = vld [vmem:[%s1560_s1 + $0x60] sm:$0xff]  ;;  %v1167_v17 = vld [vmem:[%s1560_s1 + $0x58] sm:$0xff]  ;;  %v1158_v20 = vld [vmem:[%s1560_s1 + $0x10] sm:$0xff]  ;;  %s1421_s29 = scalar_lea.vmem %s1559_s0, %s1205_s16 }
  0x12   : > { %723 = vmatpush.bf16.msra.mxu1 %v1170_v4  ;;  %v1176_v14 = vld [vmem:[%s1560_s1 + $0xa0] sm:$0xff]  ;;  %v1175_v18 = vld [vmem:[%s1560_s1 + $0x98] sm:$0xff]  ;;  %v1166_v21 = vld [vmem:[%s1560_s1 + $0x50] sm:$0xff] }
  0x13   : > { %736 = vmatpush.bf16.msra.mxu2 %v1178_v5  ;;  %v1184_v15 = vld [vmem:[%s1560_s1 + $0xe0] sm:$0xff]  ;;  %v1183_v19 = vld [vmem:[%s1560_s1 + $0xd8] sm:$0xff]  ;;  %v1174_v22 = vld [vmem:[%s1560_s1 + $0x90] sm:$0xff] }
  0x14   : > { %749 = vmatpush.bf16.msra.mxu3 %v1186_v7  ;;  %v1182_v23 = vld [vmem:[%s1560_s1 + $0xd0] sm:$0xff]  ;;  %v1157_v24 = vld [vmem:[%s1560_s1 + $0x8] sm:$0xff]  ;;  %v1156_v27 = vld [vmem:[%s1560_s1] sm:$0xff] }
  0x15   : > { %711 = vmatpush.bf16.msra.mxu0 %v1161_v8  ;;  %v1165_v25 = vld [vmem:[%s1560_s1 + $0x48] sm:$0xff]  ;;  %v1164_v29 = vld [vmem:[%s1560_s1 + $0x40] sm:$0xff]  ;;  %v1195_v32 = vld [vmem:[%s1560_s1 + $0x138] sm:$0xff] }
  0x16   : > { %724 = vmatpush.bf16.msra.mxu1 %v1169_v9  ;;  %v1173_v26 = vld [vmem:[%s1560_s1 + $0x88] sm:$0xff]  ;;  %v295_v30 = vld [vmem:[%s1421_s29] sm:$0xff]  ;;  %v1203_v33 = vld [vmem:[%s1560_s1 + $0x178] sm:$0xff] }
  0x17   : > { %737 = vmatpush.bf16.msra.mxu2 %v1177_v10  ;;  %v1181_v28 = vld [vmem:[%s1560_s1 + $0xc8] sm:$0xff]  ;;  %v1172_v34 = vld [vmem:[%s1560_s1 + $0x80] sm:$0xff]  ;;  %v297_v35 = vld [vmem:[%s1421_s29 + $0x10] sm:$0xff]  ;;  %v302_v36 = vpack.c.bf16 %v295_v30, %v295_v30 }
  0x18   : > { %750 = vmatpush.bf16.msra.mxu3 %v1185_v11  ;;  %v296_v31 = vld [vmem:[%s1421_s29 + $0x8] sm:$0xff]  ;;  %v1180_v38 = vld [vmem:[%s1560_s1 + $0xc0] sm:$0xff]  ;;  %v298_v40 = vld [vmem:[%s1421_s29 + $0x18] sm:$0xff]  ;;  %v304_v43 = vpack.c.bf16 %v297_v35, %v297_v35 }
  0x19   : > { %712 = vmatpush.bf16.msra.mxu0 %v1160_v12  ;;  %v303_v37 = vpack.c.bf16 %v296_v31, %v296_v31  ;;  %v1204_v39 = vld [vmem:[%s1560_s1 + $0x180] sm:$0xff]  ;;  %v1194_v41 = vld [vmem:[%s1560_s1 + $0x130] sm:$0xff]  ;;  %v305_v44 = vpack.c.bf16 %v298_v40, %v298_v40  ;;  %v1193_v45 = vld [vmem:[%s1560_s1 + $0x128] sm:$0xff] }
  0x1a   : > { %725 = vmatpush.bf16.msra.mxu1 %v1168_v13  ;;  %v1202_v42 = vld [vmem:[%s1560_s1 + $0x170] sm:$0xff]  ;;  %v1201_v46 = vld [vmem:[%s1560_s1 + $0x168] sm:$0xff]  ;;  %v1192_v47 = vld [vmem:[%s1560_s1 + $0x120] sm:$0xff] }
  0x1b   : > { %738 = vmatpush.bf16.msra.mxu2 %v1176_v14  ;;  %v1200_v48 = vld [vmem:[%s1560_s1 + $0x160] sm:$0xff]  ;;  %v1191_v49 = vld [vmem:[%s1560_s1 + $0x118] sm:$0xff]  ;;  %v301_v51 = vld [vmem:[%s1421_s29 + $0x30] sm:$0xff] }
  0x1c   : > { %751 = vmatpush.bf16.msra.mxu3 %v1184_v15  ;;  %v1199_v50 = vld [vmem:[%s1560_s1 + $0x158] sm:$0xff]  ;;  %v1190_v52 = vld [vmem:[%s1560_s1 + $0x110] sm:$0xff]  ;;  %v308_v54 = vpack.c.bf16 %v301_v51, %v301_v51  ;;  %v1189_v55 = vld [vmem:[%s1560_s1 + $0x108] sm:$0xff] }
  0x1d   : > { %713 = vmatpush.bf16.msra.mxu0 %v1159_v16  ;;  %v1198_v53 = vld [vmem:[%s1560_s1 + $0x150] sm:$0xff]  ;;  %v1197_v56 = vld [vmem:[%s1560_s1 + $0x148] sm:$0xff]  ;;  %v1188_v57 = vld [vmem:[%s1560_s1 + $0x100] sm:$0xff] }
  0x1e   : > { %726 = vmatpush.bf16.msra.mxu1 %v1167_v17  ;;  %v1196_v58 = vld [vmem:[%s1560_s1 + $0x140] sm:$0xff]  ;;  %v300_v60 = vld [vmem:[%s1421_s29 + $0x28] sm:$0xff]  ;;  %v816_v63 = vld [vmem:[#allocation2 + $0x78] sm:$0xff] }
  0x1f   : > { %739 = vmatpush.bf16.msra.mxu2 %v1175_v18  ;;  %v299_v59 = vld [vmem:[%s1421_s29 + $0x20] sm:$0xff]  ;;  %v307_v62 = vpack.c.bf16 %v300_v60, %v300_v60  ;;  %v815_v0 = vld [vmem:[#allocation2 + $0x70] sm:$0xff]  ;;  %v814_v1 = vld [vmem:[#allocation2 + $0x68] sm:$0xff] }
  0x20   : > { %752 = vmatpush.bf16.msra.mxu3 %v1183_v19  ;;  %v306_v61 = vpack.c.bf16 %v299_v59, %v299_v59  ;;  %v813_v2 = vld [vmem:[#allocation2 + $0x60] sm:$0xff]  ;;  %v812_v3 = vld [vmem:[#allocation2 + $0x58] sm:$0xff]  ;;  %v811_v4 = vld [vmem:[#allocation2 + $0x50] sm:$0xff] }
  0x21   : > { %714 = vmatpush.bf16.msra.mxu0 %v1158_v20  ;;  %v810_v5 = vld [vmem:[#allocation2 + $0x48] sm:$0xff]  ;;  %v809_v6 = vld [vmem:[#allocation2 + $0x40] sm:$0xff]  ;;  %v808_v7 = vld [vmem:[#allocation2 + $0x38] sm:$0xff] }
  0x22   : > { %727 = vmatpush.bf16.msra.mxu1 %v1166_v21  ;;  %v807_v8 = vld [vmem:[#allocation2 + $0x30] sm:$0xff]  ;;  %v806_v9 = vld [vmem:[#allocation2 + $0x28] sm:$0xff]  ;;  %v805_v10 = vld [vmem:[#allocation2 + $0x20] sm:$0xff] }
  0x23   : > { %740 = vmatpush.bf16.msra.mxu2 %v1174_v22  ;;  %v804_v11 = vld [vmem:[#allocation2 + $0x18] sm:$0xff]  ;;  %v803_v14 = vld [vmem:[#allocation2 + $0x10] sm:$0xff]  ;;  %v802_v15 = vld [vmem:[#allocation2 + $0x8] sm:$0xff] }
  0x24   : > { %753 = vmatpush.bf16.msra.mxu3 %v1182_v23  ;;  %v801_v16 = vld [vmem:[#allocation2] sm:$0xff]  ;;  %v857_v17 = vld [vmem:[%s1564_s5 + $0x78] sm:$0xff]  ;;  %v856_v18 = vld [vmem:[%s1564_s5 + $0x70] sm:$0xff] }
  0x25   : > { %715 = vmatpush.bf16.msra.mxu0 %v1157_v24  ;;  %v855_v21 = vld [vmem:[%s1564_s5 + $0x68] sm:$0xff]  ;;  %v854_v24 = vld [vmem:[%s1564_s5 + $0x60] sm:$0xff]  ;;  %v848_v35 = vld [vmem:[%s1564_s5 + $0x30] sm:$0xff] }
  0x26   : > { %728 = vmatpush.bf16.msra.mxu1 %v1165_v25  ;;  %v1227_v25 = vld [vmem:[%s1561_s2] ss:$0 sm:$0xff]  ;;  %v844_v51 = vld [vmem:[%s1564_s5 + $0x10] sm:$0xff] }
  0x27   : > { %741 = vmatpush.bf16.msra.mxu2 %v1173_v26  ;;  %v853_v26 = vld [vmem:[%s1564_s5 + $0x58] sm:$0xff] }
  0x28   : > { %754 = vmatpush.bf16.msra.mxu3 %v1181_v28 }
  0x29   : > { %716 = vmatpush.bf16.msra.mxu0 %v1156_v27  ;;  %v852_v27 = vld [vmem:[%s1564_s5 + $0x50] sm:$0xff] }
  0x2a   : > { %729 = vmatpush.bf16.msra.mxu1 %v1164_v29  ;;  %v851_v29 = vld [vmem:[%s1564_s5 + $0x48] sm:$0xff] }
  0x2b   : > { %742 = vmatpush.bf16.msra.mxu2 %v1172_v34  ;;  %v849_v34 = vld [vmem:[%s1564_s5 + $0x38] sm:$0xff] }
  0x2c   : > { %717 = vmatmul.bf16.vlgmr.msra.gmra.mxu0 %v302_v36  ;;  %755 = vmatpush.bf16.msra.mxu3 %v1180_v38 }
  0x2d   : > { %761 = vmatpush.bf16.msrb.mxu0 %v1195_v32  ;;  %730 = vmatmul.bf16.vlgmr.msra.gmra.mxu1 %v303_v37  ;;  %v850_v32 = vld [vmem:[%s1564_s5 + $0x40] sm:$0xff]  ;;  %v847_v37 = vld [vmem:[%s1564_s5 + $0x28] sm:$0xff] }
  0x2e   : > { %774 = vmatpush.bf16.msrb.mxu1 %v1203_v33  ;;  %743 = vmatmul.bf16.vlgmr.msra.gmra.mxu2 %v304_v43 }
  0x2f   : > { %794 = vmatpush.bf16.msrb.mxu2 %v1204_v39  ;;  %756 = vmatmul.bf16.vlgmr.msra.gmra.mxu3 %v305_v44  ;;  %v846_v39 = vld [vmem:[%s1564_s5 + $0x20] sm:$0xff] }
  0x30   : > { %821 = vmatpush.msrb.mxu3 %v816_v63 }
  0x31   : > { %762 = vmatpush.bf16.msrb.mxu0 %v1194_v41  ;;  %v845_v41 = vld [vmem:[%s1564_s5 + $0x18] sm:$0xff] }
  0x32   : > { %775 = vmatpush.bf16.msrb.mxu1 %v1202_v42  ;;  %822 = vmatpush.msrb.mxu3 %v815_v0 }
  0x33   : > { %862 = vmatpush.msra.mxu2 %v857_v17 }
  0x34   : > { %823 = vmatpush.msrb.mxu3 %v814_v1 }
  0x35   : > { %763 = vmatpush.bf16.msrb.mxu0 %v1193_v45  ;;  %863 = vmatpush.msra.mxu2 %v856_v18 }
  0x36   : > { %776 = vmatpush.bf16.msrb.mxu1 %v1201_v46  ;;  %824 = vmatpush.msrb.mxu3 %v813_v2 }
  0x37   : > { %864 = vmatpush.msra.mxu2 %v855_v21 }
  0x38   : > { %825 = vmatpush.msrb.mxu3 %v812_v3 }
  0x39   : > { %764 = vmatpush.bf16.msrb.mxu0 %v1192_v47  ;;  %865 = vmatpush.msra.mxu2 %v854_v24 }
  0x3a   : > { %777 = vmatpush.bf16.msrb.mxu1 %v1200_v48  ;;  %826 = vmatpush.msrb.mxu3 %v811_v4 }
  0x3b   : > { %866 = vmatpush.msra.mxu2 %v853_v26 }
  0x3c   : > { %827 = vmatpush.msrb.mxu3 %v810_v5 }
  0x3d   : > { %765 = vmatpush.bf16.msrb.mxu0 %v1191_v49  ;;  %867 = vmatpush.msra.mxu2 %v852_v27 }
  0x3e   : > { %778 = vmatpush.bf16.msrb.mxu1 %v1199_v50  ;;  %1153 = vmatmul.msk.bf16.vlgmr.msrb.gmra.mxu2 %vm705_vm0, %v308_v54  ;;  %v1228_v54 = vld [vmem:[%s1563_s4] ss:$0 sm:$0xff] }
  0x3f   : > { %828 = vmatpush.msrb.mxu3 %v809_v6  ;;  %868 = vmatpush.msra.mxu2 %v851_v29 }
  0x41   : > { %766 = vmatpush.bf16.msrb.mxu0 %v1190_v52  ;;  %829 = vmatpush.msrb.mxu3 %v808_v7  ;;  %v843_v52 = vld [vmem:[%s1564_s5 + $0x8] sm:$0xff] }
  0x42   : > { %779 = vmatpush.bf16.msrb.mxu1 %v1198_v53  ;;  %869 = vmatpush.msra.mxu2 %v850_v32  ;;  %v842_v53 = vld [vmem:[%s1564_s5] sm:$0xff] }
  0x43   : > { %830 = vmatpush.msrb.mxu3 %v807_v8 }
  0x44   : > { %870 = vmatpush.msra.mxu2 %v849_v34 }
  0x45   : > { %767 = vmatpush.bf16.msrb.mxu0 %v1189_v55  ;;  %831 = vmatpush.msrb.mxu3 %v806_v9 }
  0x46   : > { %780 = vmatpush.bf16.msrb.mxu1 %v1197_v56  ;;  %871 = vmatpush.msra.mxu2 %v848_v35 }
  0x47   : > { %832 = vmatpush.msrb.mxu3 %v805_v10 }
  0x48   : > { %872 = vmatpush.msra.mxu2 %v847_v37 }
  0x49   : > { %768 = vmatpush.bf16.msrb.mxu0 %v1188_v57  ;;  %833 = vmatpush.msrb.mxu3 %v804_v11 }
  0x4a   : > { %781 = vmatpush.bf16.msrb.mxu1 %v1196_v58  ;;  %873 = vmatpush.msra.mxu2 %v846_v39  ;;  %v1229_v58 = vld [vmem:[%s1565_s6] ss:$0 sm:$0xff] }
  0x4b   : > { %834 = vmatpush.msrb.mxu3 %v803_v14 }
  0x4c   : > { %769 = vmatmul.bf16.vlgmr.msrb.gmra.mxu0 %v306_v61  ;;  %874 = vmatpush.msra.mxu2 %v845_v41 }
  0x4d   : > { %782 = vmatmul.bf16.vlgmr.msrb.gmra.mxu1 %v307_v62  ;;  %835 = vmatpush.msrb.mxu3 %v802_v15 }
  0x4e   : > { %875 = vmatpush.msra.mxu2 %v844_v51 }
  0x4f   : > { %836 = vmatpush.msrb.mxu3 %v801_v16 }
  0x50   : > { %876 = vmatpush.msra.mxu2 %v843_v52 }
  0x52   : > { %877 = vmatpush.msra.mxu2 %v842_v53 }
  0xa9   : > { %v718_v12 = vpop.f32.mrf.mxu0 }
  0xaa   : > { %v731_v13 = vpop.f32.mrf.mxu1  ;;  %v719_v28 = vadd.f32 %v1227_v25, %v718_v12 }
  0xac   : > { %v732_v33 = vadd.f32 %v731_v13, %v719_v28 }
  0xb1   : > { %v720_v19 = vpop.f32.mrf.mxu0  ;;  %v744_v22 = vpop.f32.mrf.mxu2 }
  0xb2   : > { %v733_v20 = vpop.f32.mrf.mxu1  ;;  %v757_v23 = vpop.f32.mrf.mxu3  ;;  %v745_v36 = vadd.f32 %v744_v22, %v732_v33 }
  0xb4   : > { %v758_v40 = vadd.f32 %v757_v23, %v745_v36 }
  0xb9   : > { %v746_v30 = vpop.f32.mrf.mxu2 }
  0xba   : > { %v759_v31 = vpop.f32.mrf.mxu3 }
  0xc1   : > { %v796_v38 = vpop.f32.mrf.mxu2 }
  0xc9   : > { %v770_v42 = vpop.f32.mrf.mxu0  ;;  %v798_v46 = vpop.f32.mrf.mxu2 }
  0xca   : > { %v783_v43 = vpop.f32.mrf.mxu1  ;;  %v771_v44 = vadd.f32 %v770_v42, %v758_v40 }
  0xcc   : > { %v784_v45 = vadd.f32 %v783_v43, %v771_v44 }
  0xce   : > { %v797_v47 = vadd.f32 %v796_v38, %v784_v45 }
  0xd0   : > { %v800_v48 = vmax.f32 %v797_v47, 0.0 }
  0xd1   : > { %v772_v49 = vpop.f32.mrf.mxu0 }
  0xd2   : > { %v785_v50 = vpop.f32.mrf.mxu1  ;;  %837 = vmatmul.f32.vlgmr.msrb.gmra.mxu3 %v800_v48 }
 0x155   : > { %v838_v55 = vpop.f32.mrf.mxu3 }
 0x156   : > { %v839_v56 = vadd.f32 %v1228_v54, %v838_v55 }
 0x158   : > { %v841_v57 = vmax.f32 %v839_v56, 0.0 }
 0x15a   : > { %878 = vmatmul.f32.vlgmr.msra.gmra.mxu2 %v841_v57 }
 0x1dd   : > { %v879_v59 = vpop.f32.mrf.mxu2 }
 0x1de   : > { %v880_v60 = vadd.f32 %v1229_v58, %v879_v59 }
 0x1e0   : > { %882 = vst.msk [vmem:[%s293_s8] sm:$0xff] %vm705_vm0, %v880_v60 }
 0x1e1 PF: > { %s18_s24 = sadd.s32 1, %s1270_s24  }
 0x1e2   : > { %p15_p7 = scmp.ge.s32.totalorder %s18_s24, 4  }
 0x1e4   :  { %17 = sbr.rel (!%p15_p7) target bundleno = 1 (0x1), region = 83 }
 0x1e9   :  { %902 = vsyncpa [#allocation3], 1 }
 0x1ea   :  { %904 = vsyncpa [#allocation3 + $0x1], 1 }

</bundles_post_ra>
